<compile_context>
chip_gen: v5e
topology: v5e:2x2
jax: 0.10.0
libtpu: 0.0.40
codegen_flags: <defaults>
</compile_context>

<pallas_src>
import functools

import jax
import jax.numpy as jnp
from jax.experimental import pallas as pl
from jax.experimental.pallas import tpu as pltpu

SELU_ALPHA = 1.6732632423543772
SELU_SCALE = 1.0507009873554805

IN_F = 784
H0, H1, H2, OUT_F = 72, 64, 50, 10
PAD = 128  # lane-dense padded width for all hidden / output features


def _selu(x):
    # scale * (x if x > 0 else alpha * (exp(x) - 1));  SELU(0) == 0
    return SELU_SCALE * jnp.where(x > 0, x, SELU_ALPHA * (jnp.exp(x) - 1.0))


def _mlp_kernel(x_ref, w0_ref, w23_ref, w5_ref, mask_ref, o_ref):
    # x: (TB, 784) bf16; weights bf16; all matmuls accumulate in f32 on the MXU.
    h = jnp.dot(x_ref[...], w0_ref[...],
                preferred_element_type=jnp.float32)                   # (TB, 128)
    h = _selu(h).astype(jnp.bfloat16)        # SELU(0)=0 -> padded lanes stay 0
    h = jnp.dot(h, w23_ref[...],
                preferred_element_type=jnp.float32)                   # (TB, 128)
    h = _selu(h).astype(jnp.bfloat16)
    logits = jnp.dot(h, w5_ref[...],
                     preferred_element_type=jnp.float32)              # (TB, 128)

    # Additive mask: 0 on real logit columns, -1e30 on padded columns, so the
    # padded lanes never touch the softmax normalizer.
    logits = logits + mask_ref[...]

    # log-softmax over the lane-dense last axis (f32).
    m = jnp.max(logits, axis=-1, keepdims=True)
    shifted = logits - m
    lse = jnp.log(jnp.sum(jnp.exp(shifted), axis=-1, keepdims=True))
    o_ref[...] = (shifted - lse).astype(o_ref.dtype)


def _cdiv(a, b):
    return -(-a // b)


def _round_up(n, m):
    return _cdiv(n, m) * m


def _pad2d(w, rows, cols):
    r, c = w.shape
    return jnp.pad(w, ((0, rows - r), (0, cols - c)))


def _choose_tiling(b, block_b):
    """Pick (tile_rows, padded_batch).

    Keeps batch padding within one sublane-aligned tile (no "round batch up to
    a full block" waste) and prefers an even grid-step count (>= 2 when there
    is enough work) so both v7x TensorCores get equal tile counts.
    """
    n = _cdiv(b, block_b)
    if b >= 16:                       # enough rows for two sublane-aligned tiles
        if n == 1:
            n = 2
        elif n % 2:
            n += 1
    tb = _round_up(_cdiv(b, n), 8)    # sublane-aligned tile
    n = _cdiv(b, tb)                  # may shrink after rounding tb up
    if n > 1 and n % 2:
        n += 1                        # keep even step count for v7x megacore
    return tb, n * tb


@functools.partial(jax.jit, static_argnames=("block_b",))
def linear_selu_11(x, w0, w2, w3, w5, *, block_b=2048):
    """x: (B, 1, 28, 28) or (B, 784).  Weights are (in, out) (transposed vs torch)."""
    b = x.shape[0]
    x2d = x.reshape(b, IN_F).astype(jnp.bfloat16)

    tb, b_pad = _choose_tiling(b, block_b)
    if b_pad != b:
        x2d = jnp.pad(x2d, ((0, b_pad - b), (0, 0)))

    # Fold the bias-free, activation-free f2/f3 pair: (h @ w2) @ w3 == h @ (w2 @ w3).
    w23 = jnp.dot(w2.astype(jnp.float32), w3.astype(jnp.float32))     # (72, 50)

    # Zero-pad every feature width to 128 (lane-dense tiles), cast to bf16.
    w0p = _pad2d(w0.astype(jnp.float32), IN_F, PAD).astype(jnp.bfloat16)
    w23p = _pad2d(w23, PAD, PAD).astype(jnp.bfloat16)
    w5p = _pad2d(w5.astype(jnp.float32), PAD, PAD).astype(jnp.bfloat16)

    # (1, 128) additive logit mask: 0 for real columns, -1e30 for padded ones.
    mask = jnp.where(jnp.arange(PAD) < OUT_F, 0.0, -1e30)
    mask = mask.astype(jnp.float32).reshape(1, PAD)

    grid = (b_pad // tb,)

    # Advisory cost estimate (padded shapes = actual MXU / HBM work).
    flops = 2 * b_pad * (IN_F * PAD + PAD * PAD + PAD * PAD)
    transcendentals = b_pad * 3 * PAD                     # SELU exps + softmax exps
    bytes_accessed = (b_pad * IN_F * 2                    # bf16 x stream
                      + b_pad * PAD * 4                   # f32 padded output
                      + (IN_F * PAD + 2 * PAD * PAD) * 2  # resident bf16 weights
                      + PAD * 4)                          # mask

    # VMEM: double-buffered x / out tiles + resident weights, with 2x headroom.
    vmem_bytes = (2 * tb * IN_F * 2 + 2 * tb * PAD * 4
                  + (IN_F * PAD + 2 * PAD * PAD) * 2 + PAD * 4)
    vmem_limit = min(max(2 * vmem_bytes, 32 * 1024 * 1024), 48 * 1024 * 1024)

    out_padded = pl.pallas_call(
        _mlp_kernel,
        out_shape=jax.ShapeDtypeStruct((b_pad, PAD), jnp.float32),
        grid=grid,
        in_specs=[
            pl.BlockSpec((tb, IN_F), lambda i: (i, 0)),      # x: tiled over batch
            pl.BlockSpec((IN_F, PAD), lambda i: (0, 0)),     # weights: VMEM-resident
            pl.BlockSpec((PAD, PAD), lambda i: (0, 0)),
            pl.BlockSpec((PAD, PAD), lambda i: (0, 0)),
            pl.BlockSpec((1, PAD), lambda i: (0, 0)),        # logit mask bias
        ],
        out_specs=pl.BlockSpec((tb, PAD), lambda i: (i, 0)),  # lane-dense output
        compiler_params=pltpu.CompilerParams(
            dimension_semantics=("parallel",),
            vmem_limit_bytes=int(vmem_limit),
        ),
        cost_estimate=pl.CostEstimate(
            flops=flops,
            transcendentals=transcendentals,
            bytes_accessed=bytes_accessed,
        ),
    )(x2d, w0p, w23p, w5p, mask)

    # Strip batch padding and padded logit lanes in plain JAX.
    return out_padded[:b, :OUT_F]


def _init_weight(key, in_f, out_f):
    # PyTorch nn.Linear default init: U(-1/sqrt(in), 1/sqrt(in)); bias=False in
    # the module, so only weights.  Stored (in, out), i.e. transposed vs torch.
    bound = 1.0 / (in_f ** 0.5)
    return jax.random.uniform(key, (in_f, out_f), jnp.float32, -bound, bound)


if __name__ == "__main__":
    key = jax.random.PRNGKey(0)
    k_x, k0, k2, k3, k5 = jax.random.split(key, 5)

    batch = 2
    x = jax.random.normal(k_x, (batch, 1, 28, 28), jnp.float32)

    w0 = _init_weight(k0, 784, 72)
    w2 = _init_weight(k2, 72, 64)
    w3 = _init_weight(k3, 64, 50)
    w5 = _init_weight(k5, 50, 10)

    out = jax.block_until_ready(linear_selu_11(x, w0, w2, w3, w5))

    # Pure-JAX f32 reference (matches the PyTorch forward).
    def ref(x, w0, w2, w3, w5):
        h = x.reshape(x.shape[0], IN_F)
        h = _selu(h @ w0)
        h = (h @ w2) @ w3
        h = _selu(h)
        return jax.nn.log_softmax(h @ w5, axis=-1)

    expected = ref(x, w0, w2, w3, w5)

    assert out.shape == (batch, 10)
    # bf16 matmul operands (f32 accumulation) -> loose tolerance vs the f32 ref.
    max_err = float(jnp.max(jnp.abs(out - expected)))
    assert max_err < 5e-2, max_err
    row_sums = jnp.sum(jnp.exp(out), axis=1)
    assert jnp.allclose(row_sums, 1.0, atol=1e-5), row_sums

    print("KERNEL_OK")
</pallas_src>

<mosaic_0001>
module attributes {stable_mosaic.version = 11 : i64} {
  func.func @_mlp_kernel(%arg0: i32, %arg1: memref<8x784xbf16, #tpu.memory_space<vmem>>, %arg2: memref<784x128xbf16, #tpu.memory_space<vmem>>, %arg3: memref<128x128xbf16, #tpu.memory_space<vmem>>, %arg4: memref<128x128xbf16, #tpu.memory_space<vmem>>, %arg5: memref<1x128xf32, #tpu.memory_space<vmem>>, %arg6: memref<8x128xf32, #tpu.memory_space<vmem>>) attributes {dimension_semantics = [#tpu.dimension_semantics<parallel>], iteration_bounds = array<i64: 1>, scalar_prefetch = 0 : i64, scratch_operands = 0 : i64, tpu.core_type = #tpu.core_type<tc>, window_params = [{transform_indices = @transform_0, window_bounds = array<i64: 8, 784>}, {pipeline_mode = #tpu.pipeline_mode<synchronous>, transform_indices = @transform_1, window_bounds = array<i64: 784, 128>}, {pipeline_mode = #tpu.pipeline_mode<synchronous>, transform_indices = @transform_2, window_bounds = array<i64: 128, 128>}, {pipeline_mode = #tpu.pipeline_mode<synchronous>, transform_indices = @transform_3, window_bounds = array<i64: 128, 128>}, {pipeline_mode = #tpu.pipeline_mode<synchronous>, transform_indices = @transform_4, window_bounds = array<i64: 1, 128>}, {transform_indices = @transform_5, window_bounds = array<i64: 8, 128>}]} {
    %c0 = arith.constant 0 : index
    %c0_0 = arith.constant 0 : index
    %0 = vector.load %arg1[%c0, %c0_0] : memref<8x784xbf16, #tpu.memory_space<vmem>>, vector<8x784xbf16>
    %c0_1 = arith.constant 0 : index
    %c0_2 = arith.constant 0 : index
    %1 = vector.load %arg2[%c0_1, %c0_2] : memref<784x128xbf16, #tpu.memory_space<vmem>>, vector<784x128xbf16>
    %cst = arith.constant dense<0.000000e+00> : vector<8x128xf32>
    %2 = tpu.matmul %0, %1, %cst {dimension_numbers = #tpu.dot_dimension_numbers<[1], [0], [0], [1], [0, 0, 1, 1], [], []>} : vector<8x784xbf16>, vector<784x128xbf16>, vector<8x128xf32> -> vector<8x128xf32>
    %cst_3 = arith.constant 0.000000e+00 : f32
    %3 = vector.broadcast %cst_3 : f32 to vector<8x128xf32>
    %4 = arith.cmpf ogt, %2, %3 : vector<8x128xf32>
    %5 = math.exp %2 : vector<8x128xf32>
    %cst_4 = arith.constant 1.000000e+00 : f32
    %6 = vector.broadcast %cst_4 : f32 to vector<8x128xf32>
    %7 = arith.subf %5, %6 : vector<8x128xf32>
    %cst_5 = arith.constant 1.67326319 : f32
    %8 = vector.broadcast %cst_5 : f32 to vector<8x128xf32>
    %9 = arith.mulf %8, %7 : vector<8x128xf32>
    %10 = arith.select %4, %2, %9 : vector<8x128xi1>, vector<8x128xf32>
    %cst_6 = arith.constant 1.05070102 : f32
    %11 = vector.broadcast %cst_6 : f32 to vector<8x128xf32>
    %12 = arith.mulf %11, %10 : vector<8x128xf32>
    %13 = arith.truncf %12 : vector<8x128xf32> to vector<8x128xbf16>
    %c0_7 = arith.constant 0 : index
    %c0_8 = arith.constant 0 : index
    %14 = vector.load %arg3[%c0_7, %c0_8] : memref<128x128xbf16, #tpu.memory_space<vmem>>, vector<128x128xbf16>
    %cst_9 = arith.constant dense<0.000000e+00> : vector<8x128xf32>
    %15 = tpu.matmul %13, %14, %cst_9 {dimension_numbers = #tpu.dot_dimension_numbers<[1], [0], [0], [1], [0, 0, 1, 1], [], []>} : vector<8x128xbf16>, vector<128x128xbf16>, vector<8x128xf32> -> vector<8x128xf32>
    %cst_10 = arith.constant 0.000000e+00 : f32
    %16 = vector.broadcast %cst_10 : f32 to vector<8x128xf32>
    %17 = arith.cmpf ogt, %15, %16 : vector<8x128xf32>
    %18 = math.exp %15 : vector<8x128xf32>
    %cst_11 = arith.constant 1.000000e+00 : f32
    %19 = vector.broadcast %cst_11 : f32 to vector<8x128xf32>
    %20 = arith.subf %18, %19 : vector<8x128xf32>
    %cst_12 = arith.constant 1.67326319 : f32
    %21 = vector.broadcast %cst_12 : f32 to vector<8x128xf32>
    %22 = arith.mulf %21, %20 : vector<8x128xf32>
    %23 = arith.select %17, %15, %22 : vector<8x128xi1>, vector<8x128xf32>
    %cst_13 = arith.constant 1.05070102 : f32
    %24 = vector.broadcast %cst_13 : f32 to vector<8x128xf32>
    %25 = arith.mulf %24, %23 : vector<8x128xf32>
    %26 = arith.truncf %25 : vector<8x128xf32> to vector<8x128xbf16>
    %c0_14 = arith.constant 0 : index
    %c0_15 = arith.constant 0 : index
    %27 = vector.load %arg4[%c0_14, %c0_15] : memref<128x128xbf16, #tpu.memory_space<vmem>>, vector<128x128xbf16>
    %cst_16 = arith.constant dense<0.000000e+00> : vector<8x128xf32>
    %28 = tpu.matmul %26, %27, %cst_16 {dimension_numbers = #tpu.dot_dimension_numbers<[1], [0], [0], [1], [0, 0, 1, 1], [], []>} : vector<8x128xbf16>, vector<128x128xbf16>, vector<8x128xf32> -> vector<8x128xf32>
    %c0_17 = arith.constant 0 : index
    %c0_18 = arith.constant 0 : index
    %29 = vector.load %arg5[%c0_17, %c0_18] : memref<1x128xf32, #tpu.memory_space<vmem>>, vector<1x128xf32>
    %30 = vector.broadcast %29 : vector<1x128xf32> to vector<8x128xf32>
    %31 = arith.addf %28, %30 : vector<8x128xf32>
    %cst_19 = arith.constant dense<0xFF800000> : vector<8xf32>
    %32 = vector.multi_reduction <maximumf>, %31, %cst_19 [1] : vector<8x128xf32> to vector<8xf32>
    %33 = vector.shape_cast %32 : vector<8xf32> to vector<8x1xf32>
    %34 = vector.broadcast %33 : vector<8x1xf32> to vector<8x128xf32>
    %35 = arith.subf %31, %34 : vector<8x128xf32>
    %36 = math.exp %35 : vector<8x128xf32>
    %cst_20 = arith.constant dense<0.000000e+00> : vector<8xf32>
    %37 = vector.multi_reduction <add>, %36, %cst_20 [1] : vector<8x128xf32> to vector<8xf32>
    %38 = vector.shape_cast %37 : vector<8xf32> to vector<8x1xf32>
    %39 = math.log %38 : vector<8x1xf32>
    %40 = vector.broadcast %39 : vector<8x1xf32> to vector<8x128xf32>
    %41 = arith.subf %35, %40 : vector<8x128xf32>
    %c0_21 = arith.constant 0 : index
    %c0_22 = arith.constant 0 : index
    %42 = vector.load %arg6[%c0_21, %c0_22] : memref<8x128xf32, #tpu.memory_space<vmem>>, vector<8x128xf32>
    tpu.vector_store %arg6[%c0_21, %c0_22], %41 {strides = array<i32>} : memref<8x128xf32, #tpu.memory_space<vmem>>, vector<8x128xf32>,
    return
  }
  func.func @transform_0(%arg0: i32) -> (i32, i32) {
    %c0_i32 = arith.constant 0 : i32
    %c0_i32_0 = arith.constant 0 : i32
    return %arg0, %c0_i32 : i32, i32
  }
  func.func @transform_1(%arg0: i32) -> (i32, i32) {
    %c0_i32 = arith.constant 0 : i32
    %c0_i32_0 = arith.constant 0 : i32
    %c0_i32_1 = arith.constant 0 : i32
    return %c0_i32, %c0_i32_0 : i32, i32
  }
  func.func @transform_2(%arg0: i32) -> (i32, i32) {
    %c0_i32 = arith.constant 0 : i32
    %c0_i32_0 = arith.constant 0 : i32
    %c0_i32_1 = arith.constant 0 : i32
    return %c0_i32, %c0_i32_0 : i32, i32
  }
  func.func @transform_3(%arg0: i32) -> (i32, i32) {
    %c0_i32 = arith.constant 0 : i32
    %c0_i32_0 = arith.constant 0 : i32
    %c0_i32_1 = arith.constant 0 : i32
    return %c0_i32, %c0_i32_0 : i32, i32
  }
  func.func @transform_4(%arg0: i32) -> (i32, i32) {
    %c0_i32 = arith.constant 0 : i32
    %c0_i32_0 = arith.constant 0 : i32
    %c0_i32_1 = arith.constant 0 : i32
    return %c0_i32, %c0_i32_0 : i32, i32
  }
  func.func @transform_5(%arg0: i32) -> (i32, i32) {
    %c0_i32 = arith.constant 0 : i32
    %c0_i32_0 = arith.constant 0 : i32
    return %arg0, %c0_i32 : i32, i32
  }
}

</mosaic_0001>

<bundles_post_ra>
// kernel: linear_selu_11.1
= control target key start
LH: loop header
LB: loop body
LE: loop exit
PB: predicated region body
PF: predicated region fallthrough
CT: control target
= control target key end

     0   :  { %vm441_vm0 = vcmask 130048   ;;  %s1305_s1 = inlined_call_operand.vmem [shape: bf16[784,128], index: 1, kind: input, shape index: {}]   ;;  %s1306_s0 = inlined_call_operand.vmem [shape: bf16[8,784], index: 0, kind: input, shape index: {}]   ;;  %s1307_s2 = inlined_call_operand.vmem [shape: bf16[128,128], index: 2, kind: input, shape index: {}]   ;;  %s1308_s3 = inlined_call_operand.vmem [shape: bf16[128,128], index: 3, kind: input, shape index: {}]   ;;  %s1309_s4 = inlined_call_operand.vmem [shape: f32[1,128], index: 4, kind: input, shape index: {}]   ;;  %s1310_s5 = inlined_call_operand.vmem [shape: f32[8,128], index: 5, kind: output, shape index: {}]  }
   0x1   :  { %v995_v0 = vld [vmem:[%s1305_s1 + $0x38] sm:$0xff]  ;;  %v994_v3 = vld [vmem:[%s1305_s1 + $0x30] sm:$0xff]  ;;  %v993_v8 = vld [vmem:[%s1305_s1 + $0x28] sm:$0xff] }
   0x2   :  { %v1003_v1 = vld [vmem:[%s1305_s1 + $0x78] sm:$0xff]  ;;  %445 = vmatpush.bf16.msra.mxu0 %v995_v0  ;;  %v1002_v4 = vld [vmem:[%s1305_s1 + $0x70] sm:$0xff]  ;;  %v1001_v9 = vld [vmem:[%s1305_s1 + $0x68] sm:$0xff] }
   0x3   :  { %v1011_v2 = vld [vmem:[%s1305_s1 + $0xb8] sm:$0xff]  ;;  %458 = vmatpush.bf16.msra.mxu1 %v1003_v1  ;;  %v1010_v5 = vld [vmem:[%s1305_s1 + $0xb0] sm:$0xff]  ;;  %v1009_v10 = vld [vmem:[%s1305_s1 + $0xa8] sm:$0xff] }
   0x4   :  { %471 = vmatpush.bf16.msra.mxu2 %v1011_v2  ;;  %v1019_v6 = vld [vmem:[%s1305_s1 + $0xf8] sm:$0xff]  ;;  %v1018_v7 = vld [vmem:[%s1305_s1 + $0xf0] sm:$0xff]  ;;  %v1017_v11 = vld [vmem:[%s1305_s1 + $0xe8] sm:$0xff] }
   0x5   :  { %484 = vmatpush.bf16.msra.mxu3 %v1019_v6  ;;  %v992_v12 = vld [vmem:[%s1305_s1 + $0x20] sm:$0xff]  ;;  %v991_v16 = vld [vmem:[%s1305_s1 + $0x18] sm:$0xff]  ;;  %v990_v20 = vld [vmem:[%s1305_s1 + $0x10] sm:$0xff] }
   0x6   :  { %446 = vmatpush.bf16.msra.mxu0 %v994_v3  ;;  %v1000_v13 = vld [vmem:[%s1305_s1 + $0x60] sm:$0xff]  ;;  %v999_v17 = vld [vmem:[%s1305_s1 + $0x58] sm:$0xff]  ;;  %v998_v21 = vld [vmem:[%s1305_s1 + $0x50] sm:$0xff] }
   0x7   :  { %459 = vmatpush.bf16.msra.mxu1 %v1002_v4  ;;  %v1008_v14 = vld [vmem:[%s1305_s1 + $0xa0] sm:$0xff]  ;;  %v1007_v18 = vld [vmem:[%s1305_s1 + $0x98] sm:$0xff]  ;;  %v1006_v22 = vld [vmem:[%s1305_s1 + $0x90] sm:$0xff] }
   0x8   :  { %472 = vmatpush.bf16.msra.mxu2 %v1010_v5  ;;  %v1016_v15 = vld [vmem:[%s1305_s1 + $0xe0] sm:$0xff]  ;;  %v1015_v19 = vld [vmem:[%s1305_s1 + $0xd8] sm:$0xff]  ;;  %v1014_v23 = vld [vmem:[%s1305_s1 + $0xd0] sm:$0xff] }
   0x9   :  { %485 = vmatpush.bf16.msra.mxu3 %v1018_v7  ;;  %v989_v24 = vld [vmem:[%s1305_s1 + $0x8] sm:$0xff]  ;;  %v21_v26 = vld [vmem:[%s1306_s0] sm:$0xff]  ;;  %v1027_v34 = vld [vmem:[%s1305_s1 + $0x138] sm:$0xff] }
   0xa   :  { %447 = vmatpush.bf16.msra.mxu0 %v993_v8  ;;  %v997_v25 = vld [vmem:[%s1305_s1 + $0x48] sm:$0xff]  ;;  %v127_v30 = vunpack.c.l.b16 %v21_v26  ;;  %v128_v31 = vunpack.c.h.b16 %v21_v26  ;;  %v988_v32 = vld [vmem:[%s1305_s1] sm:$0xff]  ;;  %v1035_v35 = vld [vmem:[%s1305_s1 + $0x178] sm:$0xff] }
   0xb   :  { %460 = vmatpush.bf16.msra.mxu1 %v1001_v9  ;;  %v1005_v27 = vld [vmem:[%s1305_s1 + $0x88] sm:$0xff]  ;;  %v996_v33 = vld [vmem:[%s1305_s1 + $0x40] sm:$0xff]  ;;  %v1026_v43 = vld [vmem:[%s1305_s1 + $0x130] sm:$0xff] }
   0xc   :  { %473 = vmatpush.bf16.msra.mxu2 %v1009_v10  ;;  %v22_v28 = vld [vmem:[%s1306_s0 + $0x8] sm:$0xff]  ;;  %v1004_v36 = vld [vmem:[%s1305_s1 + $0x80] sm:$0xff]  ;;  %v134_v38 = vpack.c.b16 %v127_v30, %v127_v30  ;;  %v135_v39 = vpack.c.b16 %v128_v31, %v128_v31  ;;  %v1034_v44 = vld [vmem:[%s1305_s1 + $0x170] sm:$0xff] }
   0xd   :  { %486 = vmatpush.bf16.msra.mxu3 %v1017_v11  ;;  %v1013_v29 = vld [vmem:[%s1305_s1 + $0xc8] sm:$0xff]  ;;  %v129_v37 = vunpack.c.l.b16 %v22_v28  ;;  %v130_v40 = vunpack.c.h.b16 %v22_v28  ;;  %v1012_v41 = vld [vmem:[%s1305_s1 + $0xc0] sm:$0xff]  ;;  %v24_v51 = vld [vmem:[%s1306_s0 + $0x18] sm:$0xf] }
   0xe   :  { %448 = vmatpush.bf16.msra.mxu0 %v992_v12  ;;  %v1036_v42 = vld [vmem:[%s1305_s1 + $0x180] sm:$0xff]  ;;  %v1025_v47 = vld [vmem:[%s1305_s1 + $0x128] sm:$0xff]  ;;  %v1023_v52 = vld [vmem:[%s1305_s1 + $0x118] sm:$0xff]  ;;  %v133_v54 = vunpack.c.l.b16 %v24_v51 }
   0xf   :  { %461 = vmatpush.bf16.msra.mxu1 %v1000_v13  ;;  %v136_v45 = vpack.c.b16 %v129_v37, %v129_v37  ;;  %v137_v46 = vpack.c.b16 %v130_v40, %v130_v40  ;;  %v1033_v48 = vld [vmem:[%s1305_s1 + $0x168] sm:$0xff]  ;;  %v1024_v49 = vld [vmem:[%s1305_s1 + $0x120] sm:$0xff]  ;;  %v1031_v53 = vld [vmem:[%s1305_s1 + $0x158] sm:$0xff] }
  0x10   :  { %474 = vmatpush.bf16.msra.mxu2 %v1008_v14  ;;  %v1032_v50 = vld [vmem:[%s1305_s1 + $0x160] sm:$0xff]  ;;  %v1022_v55 = vld [vmem:[%s1305_s1 + $0x110] sm:$0xff]  ;;  %v140_v57 = vpack.c.b16 %v133_v54, %v133_v54  ;;  %v1021_v58 = vld [vmem:[%s1305_s1 + $0x108] sm:$0xff] }
  0x11   :  { %487 = vmatpush.bf16.msra.mxu3 %v1016_v15  ;;  %v1030_v56 = vld [vmem:[%s1305_s1 + $0x150] sm:$0xff]  ;;  %v1029_v59 = vld [vmem:[%s1305_s1 + $0x148] sm:$0xff]  ;;  %v1020_v63 = vld [vmem:[%s1305_s1 + $0x100] sm:$0xff] }
  0x12   :  { %449 = vmatpush.bf16.msra.mxu0 %v991_v16  ;;  %v23_v60 = vld [vmem:[%s1306_s0 + $0x10] sm:$0xff]  ;;  %v1028_v0 = vld [vmem:[%s1305_s1 + $0x140] sm:$0xff]  ;;  %v1044_v3 = vld [vmem:[%s1307_s2 + $0x38] sm:$0xff] }
  0x13   :  { %462 = vmatpush.bf16.msra.mxu1 %v999_v17  ;;  %v131_v61 = vunpack.c.l.b16 %v23_v60  ;;  %v132_v62 = vunpack.c.h.b16 %v23_v60  ;;  %v1043_v4 = vld [vmem:[%s1307_s2 + $0x30] sm:$0xff]  ;;  %v1042_v5 = vld [vmem:[%s1307_s2 + $0x28] sm:$0xff]  ;;  %v1041_v8 = vld [vmem:[%s1307_s2 + $0x20] sm:$0xff] }
  0x14   :  { %475 = vmatpush.bf16.msra.mxu2 %v1007_v18  ;;  %v1040_v9 = vld [vmem:[%s1307_s2 + $0x18] sm:$0xff]  ;;  %v1039_v13 = vld [vmem:[%s1307_s2 + $0x10] sm:$0xff]  ;;  %v1038_v15 = vld [vmem:[%s1307_s2 + $0x8] sm:$0xff] }
  0x15   :  { %488 = vmatpush.bf16.msra.mxu3 %v1015_v19  ;;  %v138_v1 = vpack.c.b16 %v131_v61, %v131_v61  ;;  %v139_v2 = vpack.c.b16 %v132_v62, %v132_v62  ;;  %v1037_v16 = vld [vmem:[%s1307_s2] sm:$0xff] }
  0x16   :  { %450 = vmatpush.bf16.msra.mxu0 %v990_v20  ;;  %v1052_v20 = vld [vmem:[%s1308_s3 + $0x38] sm:$0xff] }
  0x17   :  { %463 = vmatpush.bf16.msra.mxu1 %v998_v21 }
  0x18   :  { %476 = vmatpush.bf16.msra.mxu2 %v1006_v22  ;;  %v1051_v22 = vld [vmem:[%s1308_s3 + $0x30] sm:$0xff] }
  0x19   :  { %489 = vmatpush.bf16.msra.mxu3 %v1014_v23 }
  0x1a   :  { %451 = vmatpush.bf16.msra.mxu0 %v989_v24 }
  0x1b   :  { %464 = vmatpush.bf16.msra.mxu1 %v997_v25  ;;  %v1050_v25 = vld [vmem:[%s1308_s3 + $0x28] sm:$0xff] }
  0x1c   :  { %477 = vmatpush.bf16.msra.mxu2 %v1005_v27 }
  0x1d   :  { %490 = vmatpush.bf16.msra.mxu3 %v1013_v29 }
  0x1e   :  { %452 = vmatpush.bf16.msra.mxu0 %v988_v32 }
  0x1f   :  { %465 = vmatpush.bf16.msra.mxu1 %v996_v33 }
  0x20   :  { %478 = vmatpush.bf16.msra.mxu2 %v1004_v36 }
  0x21   :  { %453 = vmatmul.bf16.vlgmr.msra.gmra.mxu0 %v134_v38  ;;  %491 = vmatpush.bf16.msra.mxu3 %v1012_v41  ;;  %v1049_v41 = vld [vmem:[%s1308_s3 + $0x20] sm:$0xff] }
  0x22   :  { %497 = vmatpush.bf16.msrb.mxu0 %v1027_v34  ;;  %466 = vmatmul.bf16.vlgmr.msra.gmra.mxu1 %v135_v39 }
  0x23   :  { %510 = vmatpush.bf16.msrb.mxu1 %v1035_v35  ;;  %479 = vmatmul.bf16.vlgmr.msra.gmra.mxu2 %v136_v45  ;;  %v1045_v45 = vld [vmem:[%s1308_s3] sm:$0xff] }
  0x24   :  { %530 = vmatpush.bf16.msrb.mxu2 %v1036_v42  ;;  %492 = vmatmul.bf16.vlgmr.msra.gmra.mxu3 %v137_v46  ;;  %v1048_v42 = vld [vmem:[%s1308_s3 + $0x18] sm:$0xff] }
  0x25   :  { %608 = vmatpush.bf16.msrb.mxu3 %v1044_v3 }
  0x26   :  { %498 = vmatpush.bf16.msrb.mxu0 %v1026_v43  ;;  %v1047_v43 = vld [vmem:[%s1308_s3 + $0x10] sm:$0xff] }
  0x27   :  { %511 = vmatpush.bf16.msrb.mxu1 %v1034_v44  ;;  %v1046_v44 = vld [vmem:[%s1308_s3 + $0x8] sm:$0xff] }
  0x28   :  { %697 = vmatpush.bf16.msra.mxu2 %v1052_v20 }
  0x29   :  { %609 = vmatpush.bf16.msrb.mxu3 %v1043_v4 }
  0x2a   :  { %499 = vmatpush.bf16.msrb.mxu0 %v1025_v47 }
  0x2b   :  { %512 = vmatpush.bf16.msrb.mxu1 %v1033_v48 }
  0x2c   :  { %698 = vmatpush.bf16.msra.mxu2 %v1051_v22 }
  0x2d   :  { %610 = vmatpush.bf16.msrb.mxu3 %v1042_v5 }
  0x2e   :  { %500 = vmatpush.bf16.msrb.mxu0 %v1024_v49 }
  0x2f   :  { %513 = vmatpush.bf16.msrb.mxu1 %v1032_v50 }
  0x30   :  { %699 = vmatpush.bf16.msra.mxu2 %v1050_v25 }
  0x31   :  { %611 = vmatpush.bf16.msrb.mxu3 %v1041_v8 }
  0x32   :  { %501 = vmatpush.bf16.msrb.mxu0 %v1023_v52 }
  0x33   :  { %514 = vmatpush.bf16.msrb.mxu1 %v1031_v53  ;;  %921 = vmatmul.msk.bf16.vlgmr.msrb.gmra.mxu2 %vm441_vm0, %v140_v57 }
  0x34   :  { %700 = vmatpush.bf16.msra.mxu2 %v1049_v41 }
  0x35   :  { %612 = vmatpush.bf16.msrb.mxu3 %v1040_v9 }
  0x36   :  { %502 = vmatpush.bf16.msrb.mxu0 %v1022_v55  ;;  %v1053_v55 = vld [vmem:[%s1309_s4] ss:$0 sm:$0xff] }
  0x37   :  { %515 = vmatpush.bf16.msrb.mxu1 %v1030_v56 }
  0x38   :  { %701 = vmatpush.bf16.msra.mxu2 %v1048_v42 }
  0x39   :  { %613 = vmatpush.bf16.msrb.mxu3 %v1039_v13 }
  0x3a   :  { %503 = vmatpush.bf16.msrb.mxu0 %v1021_v58 }
  0x3b   :  { %516 = vmatpush.bf16.msrb.mxu1 %v1029_v59 }
  0x3c   :  { %702 = vmatpush.bf16.msra.mxu2 %v1047_v43 }
  0x3d   :  { %614 = vmatpush.bf16.msrb.mxu3 %v1038_v15 }
  0x3e   :  { %504 = vmatpush.bf16.msrb.mxu0 %v1020_v63 }
  0x3f   :  { %517 = vmatpush.bf16.msrb.mxu1 %v1028_v0 }
  0x40   :  { %703 = vmatpush.bf16.msra.mxu2 %v1046_v44 }
  0x41   :  { %505 = vmatmul.bf16.vlgmr.msrb.gmra.mxu0 %v138_v1  ;;  %615 = vmatpush.bf16.msrb.mxu3 %v1037_v16 }
  0x42   :  { %518 = vmatmul.bf16.vlgmr.msrb.gmra.mxu1 %v139_v2 }
  0x44   :  { %704 = vmatpush.bf16.msra.mxu2 %v1045_v45 }
  0x9e   :  { %v454_v6 = vpop.f32.mrf.mxu0 }
  0x9f   :  { %v467_v7 = vpop.f32.mrf.mxu1 }
  0xa0   :  { %v468_v19 = vadd.f32 %v467_v7, %v454_v6 }
  0xa6   :  { %v456_v10 = vpop.f32.mrf.mxu0  ;;  %v480_v12 = vpop.f32.mrf.mxu2 }
  0xa7   :  { %v469_v11 = vpop.f32.mrf.mxu1  ;;  %v493_v14 = vpop.f32.mrf.mxu3  ;;  %v481_v21 = vadd.f32 %v480_v12, %v468_v19 }
  0xa9   :  { %v494_v24 = vadd.f32 %v493_v14, %v481_v21 }
  0xae   :  { %v482_v17 = vpop.f32.mrf.mxu2 }
  0xaf   :  { %v495_v18 = vpop.f32.mrf.mxu3 }
  0xb6   :  { %v532_v23 = vpop.f32.mrf.mxu2 }
  0xbe   :  { %v506_v26 = vpop.f32.mrf.mxu0  ;;  %v534_v30 = vpop.f32.mrf.mxu2 }
  0xbf   :  { %v519_v27 = vpop.f32.mrf.mxu1  ;;  %v507_v28 = vadd.f32 %v506_v26, %v494_v24 }
  0xc1   :  { %v520_v29 = vadd.f32 %v519_v27, %v507_v28 }
  0xc3   :  { %v533_v31 = vadd.f32 %v532_v23, %v520_v29 }
  0xc5   :  { %v537_v32 = vmul.f32 1.442695, %v533_v31  ;;  %vm536_vm1 = vcmp.gt.f32.partialorder %v533_v31, 0.0 }
  0xc6   :  { %v508_v33 = vpop.f32.mrf.mxu0 }
  0xc7   :  { %v521_v34 = vpop.f32.mrf.mxu1  ;;  %1054 = vpow2.f32 %v537_v32 }
  0xcd   :  { %v1055_v35 = vpop.eup %1054 }
  0xce   :  { %v922_v36 = vadd.f32 -1.0, %v1055_v35 }
  0xd0   :  { %v540_v37 = vmul.f32 1.6732632, %v922_v36 }
  0xd2   :  { %v541_v38 = vsel %vm536_vm1, %v533_v31, %v540_v37 }
  0xd3   :  { %v542_v39 = vmul.f32 1.050701, %v541_v38 }
  0xd5   :  { %v543_v40 = vpack.c.bf16 %v542_v39, %v542_v39 }
  0xd7   :  { %616 = vmatmul.bf16.vlgmr.msrb.gmra.mxu3 %v543_v40 }
 0x15a   :  { %v617_v46 = vpop.f32.mrf.mxu3 }
 0x15b   :  { %v622_v47 = vmul.f32 1.442695, %v617_v46  ;;  %vm621_vm2 = vcmp.gt.f32.partialorder %v617_v46, 0.0 }
 0x15d   :  { %1056 = vpow2.f32 %v622_v47 }
 0x162   :  { %v619_v48 = vpop.f32.mrf.mxu3 }
 0x163   :  { %v1057_v49 = vpop.eup %1056 }
 0x164   :  { %v955_v50 = vadd.f32 -1.0, %v1057_v49 }
 0x166   :  { %v625_v51 = vmul.f32 1.6732632, %v955_v50 }
 0x168   :  { %v626_v52 = vsel %vm621_vm2, %v617_v46, %v625_v51 }
 0x169   :  { %v627_v53 = vmul.f32 1.050701, %v626_v52 }
 0x16b   :  { %v628_v54 = vpack.c.bf16 %v627_v53, %v627_v53 }
 0x16d   :  { %705 = vmatmul.bf16.vlgmr.msra.gmra.mxu2 %v628_v54 }
 0x1f0   :  { %v706_v56 = vpop.f32.mrf.mxu2 }
 0x1f1   :  { %v707_v57 = vadd.f32 %v1053_v55, %v706_v56 }
 0x1f3   :  { %710 = vmax.xlane.f32.xlu0 %v707_v57 }
 0x1f8   :  { %v708_v58 = vpop.f32.mrf.mxu2 }
 0x266   :  { %v711_v59 = vpop.xlane.xlu0 %710 }
 0x267   :  { %v712_v60 = vsub.f32 %v707_v57, %v711_v59 }
 0x269   :  { %v713_v61 = vmul.f32 1.442695, %v712_v60 }
 0x26b   :  { %1058 = vpow2.f32 %v713_v61 }
 0x271   :  { %v1059_v62 = vpop.eup %1058 }
 0x272   :  { %715 = vadd.xlane.f32.xlu0 %v1059_v62 }
 0x2e5   :  { %v716_v63 = vpop.xlane.xlu0 %715 }
 0x2e6   :  { %1060 = vlog2.f32 %v716_v63 }
 0x2ec   :  { %v1061_v0 = vpop.eup %1060 }
 0x2ed   :  { %v718_v1 = vmul.f32 0.6931472, %v1061_v0 }
 0x2ef   :  { %v719_v2 = vsub.f32 %v712_v60, %v718_v1 }
 0x2f1   :  { %720 = vst [vmem:[%s1310_s5] sm:$0xff] %v719_v2 }

</bundles_post_ra>
